<compile_context>
chip_gen: v6e
topology: v6e:2x2x1
jax: 0.10.0
libtpu: 0.0.40
codegen_flags: <defaults>
</compile_context>

<pallas_src>
import functools

import jax
import jax.numpy as jnp
from jax.experimental import pallas as pl
from jax.experimental.pallas import tpu as pltpu


def _round_up(n, m):
    return ((n + m - 1) // m) * m


def _nn1_kernel(x_ref, w_ref, o_ref, *, padded_dim, num_classes):
    """Fused 4-layer MLP + masked softmax on one (TB, P) batch tile.

    w_ref stacks the four weight matrices (each zero-padded to P x P) on the
    sublane axis, followed by an 8-row bias block (rows 0..3 = b1..b4).
    Zero padding is numerically inert: padded weight rows/cols and padded bias
    lanes are zero and relu(0) == 0, so padded activation lanes stay zero all
    the way to the logits, which are then excluded from the softmax.
    """
    P = padded_dim
    x = x_ref[...]                               # (TB, P); padded feature lanes are 0

    w1 = w_ref[0 * P:1 * P, :]
    w2 = w_ref[1 * P:2 * P, :]
    w3 = w_ref[2 * P:3 * P, :]
    w4 = w_ref[3 * P:4 * P, :]
    bias = w_ref[4 * P:4 * P + 8, :]             # (8, P) tile-aligned single load
    b1 = bias[0:1, :]
    b2 = bias[1:2, :]
    b3 = bias[2:3, :]
    b4 = bias[3:4, :]

    h = jnp.maximum(jnp.dot(x, w1, preferred_element_type=jnp.float32) + b1, 0.0)
    h = jnp.maximum(jnp.dot(h, w2, preferred_element_type=jnp.float32) + b2, 0.0)
    h = jnp.maximum(jnp.dot(h, w3, preferred_element_type=jnp.float32) + b3, 0.0)
    logits = jnp.maximum(
        jnp.dot(h, w4, preferred_element_type=jnp.float32) + b4, 0.0)

    # Softmax over the real classes only: padded lanes forced to -inf so they
    # contribute exp(-inf) == 0 to both the max and the denominator.
    lane = jax.lax.broadcasted_iota(jnp.int32, logits.shape, dimension=1)
    logits = jnp.where(lane < num_classes, logits, -jnp.inf)
    m = jnp.max(logits, axis=1, keepdims=True)
    e = jnp.exp(logits - m)
    denom = jnp.sum(e, axis=1, keepdims=True)
    # approx=True would push the divide fully onto the EUP but costs ~1e-3.
    o_ref[...] = e * pl.reciprocal(denom, approx=False)


def _pack_params(params, padded_dim):
    """Pack w1..w4, b1..b4 into one (4P + 8, P) zero-padded f32 slab."""
    P = padded_dim

    def pad_w(w):
        r, c = w.shape
        return jnp.pad(w.astype(jnp.float32), ((0, P - r), (0, P - c)))

    def pad_b(b):
        b = b.reshape(1, -1).astype(jnp.float32)
        return jnp.pad(b, ((0, 0), (0, P - b.shape[1])))

    rows = [
        pad_w(params["w1"]), pad_w(params["w2"]),
        pad_w(params["w3"]), pad_w(params["w4"]),
        pad_b(params["b1"]), pad_b(params["b2"]),
        pad_b(params["b3"]), pad_b(params["b4"]),
        jnp.zeros((4, P), jnp.float32),          # pad bias block to 8 sublanes
    ]
    return jnp.concatenate(rows, axis=0)


def nn_1_forward(x, params, *, block_batch=512):
    """Runs the NN_1_ forward pass as a single Pallas TPU kernel.

    x: (batch, features) float32
    params: dict with weights w{1..4} stored as (in, out) and biases b{1..4}
            stored as (1, out).  (Transposed vs. PyTorch's (out, in).)
    """
    batch, feat = x.shape
    num_classes = params["w4"].shape[1]

    # One common padded lane width covers every layer width
    # (F >= round(F/2)+1, and 10, 2 <= 128).
    P = _round_up(max(feat, 128), 128)
    TB = min(block_batch, _round_up(batch, 8))   # rows per grid step
    bp = _round_up(batch, TB)                    # padded batch (last tile padded)

    xp = jnp.pad(x.astype(jnp.float32), ((0, bp - batch), (0, P - feat)))
    slab = _pack_params(params, P)               # single parameter DMA

    kernel = functools.partial(
        _nn1_kernel, padded_dim=P, num_classes=num_classes)

    out = pl.pallas_call(
        kernel,
        out_shape=jax.ShapeDtypeStruct((bp, P), jnp.float32),
        grid=(pl.cdiv(bp, TB),),
        in_specs=[
            pl.BlockSpec((TB, P), lambda i: (i, 0)),      # pipelined batch tiles
            pl.BlockSpec(slab.shape, lambda i: (0, 0)),   # params VMEM-resident
        ],
        out_specs=pl.BlockSpec((TB, P), lambda i: (i, 0)),  # lane-dense store
        compiler_params=pltpu.CompilerParams(
            dimension_semantics=("parallel",)),             # megacore on v7x
    )(xp, slab)

    # Drop batch padding rows and padded class lanes.
    return out[:batch, :num_classes]


def init_params(key, features):
    """Deterministic parameter init matching NN_1_ layer shapes."""
    h2 = round(features / 2) + 1
    dims = [(features, features), (features, h2), (h2, 10), (10, 2)]
    params = {}
    for idx, (fan_in, fan_out) in enumerate(dims, start=1):
        key, kw, kb = jax.random.split(key, 3)
        bound = 1.0 / jnp.sqrt(fan_in)
        params[f"w{idx}"] = jax.random.uniform(
            kw, (fan_in, fan_out), jnp.float32, -bound, bound)
        params[f"b{idx}"] = jax.random.uniform(
            kb, (1, fan_out), jnp.float32, -bound, bound)
    return params


def nn_1_reference(x, params):
    """Pure-JAX reference of the same forward pass."""
    h = jnp.maximum(x @ params["w1"] + params["b1"], 0.0)
    h = jnp.maximum(h @ params["w2"] + params["b2"], 0.0)
    h = jnp.maximum(h @ params["w3"] + params["b3"], 0.0)
    logits = jnp.maximum(h @ params["w4"] + params["b4"], 0.0)
    return jax.nn.softmax(logits, axis=1)


if __name__ == "__main__":
    key = jax.random.PRNGKey(0)
    key, kx, kp = jax.random.split(key, 3)

    # Small shapes consistent with the module.
    batch, features = 8, 16
    x = jax.random.normal(kx, (batch, features), jnp.float32)
    params = init_params(kp, features)

    out = jax.block_until_ready(nn_1_forward(x, params))
    ref = nn_1_reference(x, params)
    assert out.shape == (batch, 2)
    assert jnp.allclose(out, ref, atol=1e-5, rtol=1e-5)
    assert jnp.allclose(jnp.sum(out, axis=1), jnp.ones((batch,)), atol=1e-5)

    # Second check: batch not divisible by the tile -> exercises the grid,
    # the padded last tile, and the megacore-parallel axis.
    key, kx2 = jax.random.split(key)
    x2 = jax.random.normal(kx2, (600, features), jnp.float32)
    out2 = jax.block_until_ready(nn_1_forward(x2, params, block_batch=256))
    ref2 = nn_1_reference(x2, params)
    assert out2.shape == (600, 2)
    assert jnp.allclose(out2, ref2, atol=1e-5, rtol=1e-5)

    print("KERNEL_OK")
</pallas_src>

<mosaic_0001>
module attributes {stable_mosaic.version = 11 : i64} {
  func.func @_nn1_kernel(%arg0: i32, %arg1: memref<8x128xf32, #tpu.memory_space<vmem>>, %arg2: memref<520x128xf32, #tpu.memory_space<vmem>>, %arg3: memref<8x128xf32, #tpu.memory_space<vmem>>) attributes {dimension_semantics = [#tpu.dimension_semantics<parallel>], iteration_bounds = array<i64: 1>, scalar_prefetch = 0 : i64, scratch_operands = 0 : i64, tpu.core_type = #tpu.core_type<tc>, window_params = [{transform_indices = @transform_0, window_bounds = array<i64: 8, 128>}, {pipeline_mode = #tpu.pipeline_mode<synchronous>, transform_indices = @transform_1, window_bounds = array<i64: 520, 128>}, {transform_indices = @transform_2, window_bounds = array<i64: 8, 128>}]} {
    %c0 = arith.constant 0 : index
    %c0_0 = arith.constant 0 : index
    %0 = vector.load %arg1[%c0, %c0_0] : memref<8x128xf32, #tpu.memory_space<vmem>>, vector<8x128xf32>
    %c0_1 = arith.constant 0 : index
    %c0_2 = arith.constant 0 : index
    %1 = vector.load %arg2[%c0_1, %c0_2] : memref<520x128xf32, #tpu.memory_space<vmem>>, vector<128x128xf32>
    %c128 = arith.constant 128 : index
    %c0_3 = arith.constant 0 : index
    %2 = vector.load %arg2[%c128, %c0_3] : memref<520x128xf32, #tpu.memory_space<vmem>>, vector<128x128xf32>
    %c256 = arith.constant 256 : index
    %c0_4 = arith.constant 0 : index
    %3 = vector.load %arg2[%c256, %c0_4] : memref<520x128xf32, #tpu.memory_space<vmem>>, vector<128x128xf32>
    %c384 = arith.constant 384 : index
    %c0_5 = arith.constant 0 : index
    %4 = vector.load %arg2[%c384, %c0_5] : memref<520x128xf32, #tpu.memory_space<vmem>>, vector<128x128xf32>
    %c512 = arith.constant 512 : index
    %c0_6 = arith.constant 0 : index
    %5 = vector.load %arg2[%c512, %c0_6] : memref<520x128xf32, #tpu.memory_space<vmem>>, vector<8x128xf32>
    %6 = vector.extract_strided_slice %5 {offsets = [0, 0], sizes = [1, 128], strides = [1, 1]} : vector<8x128xf32> to vector<1x128xf32>
    %7 = vector.extract_strided_slice %5 {offsets = [1, 0], sizes = [1, 128], strides = [1, 1]} : vector<8x128xf32> to vector<1x128xf32>
    %8 = vector.extract_strided_slice %5 {offsets = [2, 0], sizes = [1, 128], strides = [1, 1]} : vector<8x128xf32> to vector<1x128xf32>
    %9 = vector.extract_strided_slice %5 {offsets = [3, 0], sizes = [1, 128], strides = [1, 1]} : vector<8x128xf32> to vector<1x128xf32>
    %cst = arith.constant dense<0.000000e+00> : vector<8x128xf32>
    %10 = tpu.matmul %0, %1, %cst {dimension_numbers = #tpu.dot_dimension_numbers<[1], [0], [0], [1], [0, 0, 1, 1], [], []>} : vector<8x128xf32>, vector<128x128xf32>, vector<8x128xf32> -> vector<8x128xf32>
    %11 = vector.broadcast %6 : vector<1x128xf32> to vector<8x128xf32>
    %12 = arith.addf %10, %11 : vector<8x128xf32>
    %cst_7 = arith.constant 0.000000e+00 : f32
    %13 = vector.broadcast %cst_7 : f32 to vector<8x128xf32>
    %14 = arith.maximumf %12, %13 : vector<8x128xf32>
    %cst_8 = arith.constant dense<0.000000e+00> : vector<8x128xf32>
    %15 = tpu.matmul %14, %2, %cst_8 {dimension_numbers = #tpu.dot_dimension_numbers<[1], [0], [0], [1], [0, 0, 1, 1], [], []>} : vector<8x128xf32>, vector<128x128xf32>, vector<8x128xf32> -> vector<8x128xf32>
    %16 = vector.broadcast %7 : vector<1x128xf32> to vector<8x128xf32>
    %17 = arith.addf %15, %16 : vector<8x128xf32>
    %cst_9 = arith.constant 0.000000e+00 : f32
    %18 = vector.broadcast %cst_9 : f32 to vector<8x128xf32>
    %19 = arith.maximumf %17, %18 : vector<8x128xf32>
    %cst_10 = arith.constant dense<0.000000e+00> : vector<8x128xf32>
    %20 = tpu.matmul %19, %3, %cst_10 {dimension_numbers = #tpu.dot_dimension_numbers<[1], [0], [0], [1], [0, 0, 1, 1], [], []>} : vector<8x128xf32>, vector<128x128xf32>, vector<8x128xf32> -> vector<8x128xf32>
    %21 = vector.broadcast %8 : vector<1x128xf32> to vector<8x128xf32>
    %22 = arith.addf %20, %21 : vector<8x128xf32>
    %cst_11 = arith.constant 0.000000e+00 : f32
    %23 = vector.broadcast %cst_11 : f32 to vector<8x128xf32>
    %24 = arith.maximumf %22, %23 : vector<8x128xf32>
    %cst_12 = arith.constant dense<0.000000e+00> : vector<8x128xf32>
    %25 = tpu.matmul %24, %4, %cst_12 {dimension_numbers = #tpu.dot_dimension_numbers<[1], [0], [0], [1], [0, 0, 1, 1], [], []>} : vector<8x128xf32>, vector<128x128xf32>, vector<8x128xf32> -> vector<8x128xf32>
    %26 = vector.broadcast %9 : vector<1x128xf32> to vector<8x128xf32>
    %27 = arith.addf %25, %26 : vector<8x128xf32>
    %cst_13 = arith.constant 0.000000e+00 : f32
    %28 = vector.broadcast %cst_13 : f32 to vector<8x128xf32>
    %29 = arith.maximumf %27, %28 : vector<8x128xf32>
    %30 = tpu.iota {dimensions = array<i32: 1>} : vector<8x128xi32>
    %c2_i32 = arith.constant 2 : i32
    %31 = vector.broadcast %c2_i32 : i32 to vector<8x128xi32>
    %32 = arith.cmpi slt, %30, %31 : vector<8x128xi32>
    %cst_14 = arith.constant 0xFF800000 : f32
    %33 = vector.broadcast %cst_14 : f32 to vector<8x128xf32>
    %34 = arith.select %32, %29, %33 : vector<8x128xi1>, vector<8x128xf32>
    %cst_15 = arith.constant dense<0xFF800000> : vector<8xf32>
    %35 = vector.multi_reduction <maximumf>, %34, %cst_15 [1] : vector<8x128xf32> to vector<8xf32>
    %36 = vector.shape_cast %35 : vector<8xf32> to vector<8x1xf32>
    %37 = vector.broadcast %36 : vector<8x1xf32> to vector<8x128xf32>
    %38 = arith.subf %34, %37 : vector<8x128xf32>
    %39 = math.exp %38 : vector<8x128xf32>
    %cst_16 = arith.constant dense<0.000000e+00> : vector<8xf32>
    %40 = vector.multi_reduction <add>, %39, %cst_16 [1] : vector<8x128xf32> to vector<8xf32>
    %41 = vector.shape_cast %40 : vector<8xf32> to vector<8x1xf32>
    %42 = tpu.reciprocal %41 : vector<8x1xf32> -> vector<8x1xf32>
    %43 = vector.broadcast %42 : vector<8x1xf32> to vector<8x128xf32>
    %44 = arith.mulf %39, %43 : vector<8x128xf32>
    %c0_17 = arith.constant 0 : index
    %c0_18 = arith.constant 0 : index
    %45 = vector.load %arg3[%c0_17, %c0_18] : memref<8x128xf32, #tpu.memory_space<vmem>>, vector<8x128xf32>
    tpu.vector_store %arg3[%c0_17, %c0_18], %44 {strides = array<i32>} : memref<8x128xf32, #tpu.memory_space<vmem>>, vector<8x128xf32>,
    return
  }
  func.func @transform_0(%arg0: i32) -> (i32, i32) {
    %c0_i32 = arith.constant 0 : i32
    %c0_i32_0 = arith.constant 0 : i32
    return %arg0, %c0_i32 : i32, i32
  }
  func.func @transform_1(%arg0: i32) -> (i32, i32) {
    %c0_i32 = arith.constant 0 : i32
    %c0_i32_0 = arith.constant 0 : i32
    %c0_i32_1 = arith.constant 0 : i32
    return %c0_i32, %c0_i32_0 : i32, i32
  }
  func.func @transform_2(%arg0: i32) -> (i32, i32) {
    %c0_i32 = arith.constant 0 : i32
    %c0_i32_0 = arith.constant 0 : i32
    return %arg0, %c0_i32 : i32, i32
  }
}

</mosaic_0001>

<bundles_post_ra>
// kernel: tpu_custom_call.1
= control target key start
LH: loop header
LB: loop body
LE: loop exit
PB: predicated region body
PF: predicated region fallthrough
CT: control target
= control target key end

     0   :  { %7 = vsyncpa [#allocation3], 0  ;;  %s836_s0 = inlined_call_operand.hbm [shape: f32[8,128], index: 0, kind: input, shape index: {}]   ;;  %s837_s1 = inlined_call_operand.hbm [shape: f32[520,128], index: 1, kind: input, shape index: {}]   ;;  %s838_s2 = inlined_call_operand.hbm [shape: f32[8,128], index: 2, kind: output, shape index: {}]  }
   0x1   :  { %8 = vsyncpa [#allocation6], 0 }
   0x2   :  { %9 = vsyncpa [#allocation4], 0  ;;  %s719_s9 = smov [#allocation2]   ;;  %s720_s11 = smov [#allocation5]  }
   0x3   :  { %s16_s10 = sshll.u32 %s719_s9, 4  ;;  %s25_s12 = sshll.u32 %s720_s11, 4  ;;  %s17_s10 = int_to_ptr.vmem [resolvable:$true] %s16_s10  ;;  %s26_s12 = int_to_ptr.vmem [resolvable:$true] %s25_s12 }
   0x4   :  { %s661_s13 = scalar_lea.vmem %s17_s10, 128  ;;  %p666_p1 = scmp.lt.s32.totalorder %s17_s10, %s17_s10 }
   0x5   :  { %p662_p0 = scmp.ne.s32.totalorder %s17_s10, %s661_s13  ;;  %p667_p2 = scmp.lt.s32.totalorder %s661_s13, %s661_s13 }
   0x7   :  { %p668_p3 = por %p667_p2, %p666_p1 }
   0x9   :  { %p669_p4 = pnand %p668_p3, %p662_p0 }
   0xb   :  { %672 = shalt.err (!%p669_p4)
}
   0xc   :  { %19 = dma.hbm_to_vmem [thread:$0]  %s836_s0, 128, %s17_s10, [#allocation3]  }
   0xd   :  { %s681_s16 = scalar_lea.vmem %s26_s12, 8320  ;;  %p686_p6 = scmp.lt.s32.totalorder %s26_s12, %s26_s12 }
   0xe   :  { %p682_p5 = scmp.ne.s32.totalorder %s26_s12, %s681_s16  ;;  %p687_p7 = scmp.lt.s32.totalorder %s681_s16, %s681_s16 }
  0x10   :  { %p688_p8 = por %p687_p7, %p686_p6 }
  0x12   :  { %p689_p9 = pnand %p688_p8, %p682_p5 }
  0x14   :  { %692 = shalt.err (!%p689_p9)
}
  0x15   :  { %s721_s17 = smov 128   ;;  %s722_s18 = smov 8  }
  0x16   :  { %31 = dma.hbm_to_vmem [thread:$0]  %s837_s1, 8320, %s26_s12, [#allocation6], %s721_s17, %s721_s17, %s722_s18  }
  0x17   :  { %713 = dma.done.wait [#allocation3], 128  }
  0x18   :  { %714 = vsyncadd [#allocation3], 4294967168 }
  0x19   :  { %715 = dma.done.wait [#allocation6], 8320  }
  0x1a   :  { %716 = vsyncadd [#allocation6], 4294958976  ;;  %v723_v0 = vmov 0.0   ;;  %vm724_vm0 = vmmov 0   ;;  %v54_v1 = vld [vmem:[#allocation5 + $0x78] sm:$0xff]  ;;  %v53_v2 = vld [vmem:[#allocation5 + $0x70] sm:$0xff]  ;;  %v104_v47 = vlaneseq }
  0x1b   :  { %502 = vmatprep.subr.mxu0 %v723_v0  ;;  %534 = vmatprep.mubr.msk.f32.mxu0 %vm724_vm0, %v723_v0  ;;  %v52_v3 = vld [vmem:[#allocation5 + $0x68] sm:$0xff]  ;;  %v51_v4 = vld [vmem:[#allocation5 + $0x60] sm:$0xff]  ;;  %v70_v5 = vld [vmem:[#allocation5 + $0xf8] sm:$0xff]  ;;  %s725_s0 = smov [#allocation7]  }
  0x1c   :  { %537 = vmatprep.subr.mxu1 %v723_v0  ;;  %569 = vmatprep.mubr.msk.f32.mxu1 %vm724_vm0, %v723_v0  ;;  %v50_v6 = vld [vmem:[#allocation5 + $0x58] sm:$0xff]  ;;  %v69_v7 = vld [vmem:[#allocation5 + $0xf0] sm:$0xff]  ;;  %v68_v8 = vld [vmem:[#allocation5 + $0xe8] sm:$0xff]  ;;  %v801_v48 = vshrl.u32 %v104_v47, 7  ;;  %s424_s1 = sshll.u32 %s725_s0, 4  ;;  %s425_s1 = int_to_ptr.vmem [resolvable:$true] %s424_s1 }
  0x1d   :  { %503 = vmatpush3.msra.mxu0 %v54_v1  ;;  %538 = vmatpush3.msra.mxu1 %v70_v5  ;;  %v49_v9 = vld [vmem:[#allocation5 + $0x50] sm:$0xff]  ;;  %v67_v10 = vld [vmem:[#allocation5 + $0xe0] sm:$0xff]  ;;  %v48_v11 = vld [vmem:[#allocation5 + $0x48] sm:$0xff]  ;;  %s693_s21 = scalar_lea.vmem %s425_s1, 128  ;;  %p698_p11 = scmp.lt.s32.totalorder %s425_s1, %s425_s1 }
  0x1e   :  { %504 = vmatprep.subr.mxu0 %v723_v0  ;;  %539 = vmatprep.subr.mxu1 %v723_v0  ;;  %v66_v12 = vld [vmem:[#allocation5 + $0xd8] sm:$0xff]  ;;  %v47_v13 = vld [vmem:[#allocation5 + $0x40] sm:$0xff]  ;;  %v65_v14 = vld [vmem:[#allocation5 + $0xd0] sm:$0xff]  ;;  %v106_v49 = vsub.s32 0, %v801_v48  ;;  %p694_p10 = scmp.ne.s32.totalorder %s425_s1, %s693_s21  ;;  %p699_p12 = scmp.lt.s32.totalorder %s693_s21, %s693_s21 }
  0x1f   :  { %505 = vmatpush3.msra.mxu0 %v53_v2  ;;  %540 = vmatpush3.msra.mxu1 %v69_v7  ;;  %v46_v15 = vld [vmem:[#allocation5 + $0x38] sm:$0xff]  ;;  %v64_v16 = vld [vmem:[#allocation5 + $0xc8] sm:$0xff]  ;;  %v45_v17 = vld [vmem:[#allocation5 + $0x30] sm:$0xff] }
  0x20   :  { %506 = vmatprep.subr.mxu0 %v723_v0  ;;  %541 = vmatprep.subr.mxu1 %v723_v0  ;;  %v63_v18 = vld [vmem:[#allocation5 + $0xc0] sm:$0xff]  ;;  %v44_v19 = vld [vmem:[#allocation5 + $0x28] sm:$0xff]  ;;  %v62_v20 = vld [vmem:[#allocation5 + $0xb8] sm:$0xff]  ;;  %p700_p13 = por %p699_p12, %p698_p11 }
  0x21   :  { %507 = vmatpush3.msra.mxu0 %v52_v3  ;;  %542 = vmatpush3.msra.mxu1 %v68_v8  ;;  %v43_v21 = vld [vmem:[#allocation5 + $0x20] sm:$0xff]  ;;  %v61_v22 = vld [vmem:[#allocation5 + $0xb0] sm:$0xff]  ;;  %v42_v23 = vld [vmem:[#allocation5 + $0x18] sm:$0xff] }
  0x22   :  { %508 = vmatprep.subr.mxu0 %v723_v0  ;;  %543 = vmatprep.subr.mxu1 %v723_v0  ;;  %v60_v24 = vld [vmem:[#allocation5 + $0xa8] sm:$0xff]  ;;  %v41_v25 = vld [vmem:[#allocation5 + $0x10] sm:$0xff]  ;;  %v59_v26 = vld [vmem:[#allocation5 + $0xa0] sm:$0xff]  ;;  %p701_p0 = pnand %p700_p13, %p694_p10 }
  0x23   :  { %509 = vmatpush3.msra.mxu0 %v51_v4  ;;  %544 = vmatpush3.msra.mxu1 %v67_v10  ;;  %v40_v27 = vld [vmem:[#allocation5 + $0x8] sm:$0xff]  ;;  %v58_v28 = vld [vmem:[#allocation5 + $0x98] sm:$0xff]  ;;  %v39_v29 = vld [vmem:[#allocation5] sm:$0xff] }
  0x24   :  { %510 = vmatprep.subr.mxu0 %v723_v0  ;;  %545 = vmatprep.subr.mxu1 %v723_v0  ;;  %v38_v30 = vld [vmem:[#allocation2] sm:$0xff]  ;;  %v57_v31 = vld [vmem:[#allocation5 + $0x90] sm:$0xff]  ;;  %v56_v32 = vld [vmem:[#allocation5 + $0x88] sm:$0xff] }
  0x25   :  { %511 = vmatpush3.msra.mxu0 %v50_v6  ;;  %546 = vmatpush3.msra.mxu1 %v66_v12  ;;  %v55_v33 = vld [vmem:[#allocation5 + $0x80] sm:$0xff]  ;;  %v86_v34 = vld [vmem:[#allocation5 + $0x178] sm:$0xff]  ;;  %v85_v35 = vld [vmem:[#allocation5 + $0x170] sm:$0xff] }
  0x26   :  { %512 = vmatprep.subr.mxu0 %v723_v0  ;;  %547 = vmatprep.subr.mxu1 %v723_v0  ;;  %v84_v36 = vld [vmem:[#allocation5 + $0x168] sm:$0xff]  ;;  %v83_v37 = vld [vmem:[#allocation5 + $0x160] sm:$0xff]  ;;  %v82_v38 = vld [vmem:[#allocation5 + $0x158] sm:$0xff] }
  0x27   :  { %513 = vmatpush3.msra.mxu0 %v49_v9  ;;  %548 = vmatpush3.msra.mxu1 %v65_v14  ;;  %v81_v39 = vld [vmem:[#allocation5 + $0x150] sm:$0xff]  ;;  %v80_v40 = vld [vmem:[#allocation5 + $0x148] sm:$0xff]  ;;  %v79_v41 = vld [vmem:[#allocation5 + $0x140] sm:$0xff]  ;;  %v181_v9 = vsub.s32 1, %v801_v48 }
  0x28   :  { %514 = vmatprep.subr.mxu0 %v723_v0  ;;  %549 = vmatprep.subr.mxu1 %v723_v0  ;;  %v78_v42 = vld [vmem:[#allocation5 + $0x138] sm:$0xff]  ;;  %v77_v43 = vld [vmem:[#allocation5 + $0x130] sm:$0xff]  ;;  %v76_v44 = vld [vmem:[#allocation5 + $0x128] sm:$0xff] }
  0x29   :  { %515 = vmatpush3.msra.mxu0 %v48_v11  ;;  %550 = vmatpush3.msra.mxu1 %v64_v16  ;;  %v75_v45 = vld [vmem:[#allocation5 + $0x120] sm:$0xff]  ;;  %v74_v46 = vld [vmem:[#allocation5 + $0x118] sm:$0xff]  ;;  %v73_v56 = vld [vmem:[#allocation5 + $0x110] sm:$0xff] }
  0x2a   :  { %516 = vmatprep.subr.mxu0 %v723_v0  ;;  %551 = vmatprep.subr.mxu1 %v723_v0  ;;  %v804_v50 = vld [vmem:[#allocation5 + $0x200] sm:$0xff]  ;;  %v72_v57 = vld [vmem:[#allocation5 + $0x108] sm:$0xff]  ;;  %v102_v59 = vld [vmem:[#allocation5 + $0x1f8] sm:$0xff] }
  0x2b   :  { %517 = vmatpush3.msra.mxu0 %v47_v13  ;;  %552 = vmatpush3.msra.mxu1 %v63_v18  ;;  %v107_v51 = vrot.slane %v804_v50, %v106_v49  ;;  %v71_v58 = vld [vmem:[#allocation5 + $0x100] sm:$0xff]  ;;  %v101_v60 = vld [vmem:[#allocation5 + $0x1f0] sm:$0xff]  ;;  %v100_v61 = vld [vmem:[#allocation5 + $0x1e8] sm:$0xff]  ;;  %v182_v10 = vrot.slane %v804_v50, %v181_v9  ;;  %v256_v18 = vsub.s32 2, %v801_v48 }
  0x2c   :  { %518 = vmatprep.subr.mxu0 %v723_v0  ;;  %553 = vmatprep.subr.mxu1 %v723_v0  ;;  %v99_v62 = vld [vmem:[#allocation5 + $0x1e0] sm:$0xff]  ;;  %v98_v63 = vld [vmem:[#allocation5 + $0x1d8] sm:$0xff]  ;;  %v97_v1 = vld [vmem:[#allocation5 + $0x1d0] sm:$0xff] }
  0x2d   :  { %519 = vmatpush3.msra.mxu0 %v46_v15  ;;  %554 = vmatpush3.msra.mxu1 %v62_v20  ;;  %v96_v2 = vld [vmem:[#allocation5 + $0x1c8] sm:$0xff]  ;;  %v95_v3 = vld [vmem:[#allocation5 + $0x1c0] sm:$0xff]  ;;  %v94_v4 = vld [vmem:[#allocation5 + $0x1b8] sm:$0xff] }
  0x2e   :  { %520 = vmatprep.subr.mxu0 %v723_v0  ;;  %555 = vmatprep.subr.mxu1 %v723_v0  ;;  %v93_v5 = vld [vmem:[#allocation5 + $0x1b0] sm:$0xff]  ;;  %v92_v6 = vld [vmem:[#allocation5 + $0x1a8] sm:$0xff]  ;;  %v91_v7 = vld [vmem:[#allocation5 + $0x1a0] sm:$0xff] }
  0x2f   :  { %521 = vmatpush3.msra.mxu0 %v45_v17  ;;  %556 = vmatpush3.msra.mxu1 %v61_v22  ;;  %v90_v8 = vld [vmem:[#allocation5 + $0x198] sm:$0xff]  ;;  %v89_v15 = vld [vmem:[#allocation5 + $0x190] sm:$0xff]  ;;  %v88_v16 = vld [vmem:[#allocation5 + $0x188] sm:$0xff] }
  0x30   :  { %522 = vmatprep.subr.mxu0 %v723_v0  ;;  %557 = vmatprep.subr.mxu1 %v723_v0  ;;  %v87_v17 = vld [vmem:[#allocation5 + $0x180] sm:$0xff] }
  0x31   :  { %523 = vmatpush3.msra.mxu0 %v44_v19  ;;  %558 = vmatpush3.msra.mxu1 %v60_v24  ;;  %v257_v19 = vrot.slane %v804_v50, %v256_v18  ;;  %v331_v24 = vsub.s32 3, %v801_v48 }
  0x32   :  { %524 = vmatprep.subr.mxu0 %v723_v0  ;;  %559 = vmatprep.subr.mxu1 %v723_v0 }
  0x33   :  { %525 = vmatpush3.msra.mxu0 %v43_v21  ;;  %560 = vmatpush3.msra.mxu1 %v59_v26  ;;  %v405_v26 = vand.u32 127, %v104_v47 }
  0x34   :  { %526 = vmatprep.subr.mxu0 %v723_v0  ;;  %561 = vmatprep.subr.mxu1 %v723_v0 }
  0x35   :  { %527 = vmatpush3.msra.mxu0 %v42_v23  ;;  %562 = vmatpush3.msra.mxu1 %v58_v28  ;;  %vm406_vm1 = vcmp.lt.s32.totalorder %v405_v26, 2 }
  0x36   :  { %528 = vmatprep.subr.mxu0 %v723_v0  ;;  %563 = vmatprep.subr.mxu1 %v723_v0 }
  0x37   :  { %529 = vmatpush3.msra.mxu0 %v41_v25  ;;  %564 = vmatpush3.msra.mxu1 %v57_v31  ;;  %v332_v25 = vrot.slane %v804_v50, %v331_v24 }
  0x38   :  { %530 = vmatprep.subr.mxu0 %v723_v0  ;;  %565 = vmatprep.subr.mxu1 %v723_v0 }
  0x39   :  { %531 = vmatpush3.msra.mxu0 %v40_v27  ;;  %566 = vmatpush3.msra.mxu1 %v56_v32 }
  0x3a   :  { %532 = vmatprep.subr.mxu0 %v723_v0  ;;  %567 = vmatprep.subr.mxu1 %v723_v0 }
  0x3b   :  { %533 = vmatpush3.msra.mxu0 %v39_v29  ;;  %568 = vmatpush3.msra.mxu1 %v55_v33 }
  0x3c   :  { %535 = vmatmul.mubr.f32.vlgmr.msra.gmra.mxu0 %v38_v30  ;;  %572 = vmatprep.subr.mxu0 %v723_v0 }
  0x3d   :  { %604 = vmatprep.mubr.msk.f32.mxu0 %vm724_vm0, %v723_v0  ;;  %607 = vmatprep.subr.mxu1 %v723_v0 }
  0x3e   :  { %573 = vmatpush3.msra.mxu0 %v86_v34 }
  0x3f   :  { %574 = vmatprep.subr.mxu0 %v723_v0 }
  0x40   :  { %575 = vmatpush3.msra.mxu0 %v85_v35 }
  0x41   :  { %576 = vmatprep.subr.mxu0 %v723_v0 }
  0x42   :  { %577 = vmatpush3.msra.mxu0 %v84_v36 }
  0x43   :  { %578 = vmatprep.subr.mxu0 %v723_v0 }
  0x44   :  { %579 = vmatpush3.msra.mxu0 %v83_v37 }
  0x45   :  { %580 = vmatprep.subr.mxu0 %v723_v0 }
  0x46   :  { %581 = vmatpush3.msra.mxu0 %v82_v38 }
  0x47   :  { %582 = vmatprep.subr.mxu0 %v723_v0 }
  0x48   :  { %583 = vmatpush3.msra.mxu0 %v81_v39 }
  0x49   :  { %584 = vmatprep.subr.mxu0 %v723_v0 }
  0x4a   :  { %585 = vmatpush3.msra.mxu0 %v80_v40 }
  0x4b   :  { %586 = vmatprep.subr.mxu0 %v723_v0 }
  0x4c   :  { %587 = vmatpush3.msra.mxu0 %v79_v41 }
  0x4d   :  { %588 = vmatprep.subr.mxu0 %v723_v0 }
  0x4e   :  { %589 = vmatpush3.msra.mxu0 %v78_v42 }
  0x4f   :  { %590 = vmatprep.subr.mxu0 %v723_v0 }
  0x50   :  { %591 = vmatpush3.msra.mxu0 %v77_v43 }
  0x51   :  { %592 = vmatprep.subr.mxu0 %v723_v0 }
  0x52   :  { %593 = vmatpush3.msra.mxu0 %v76_v44 }
  0x53   :  { %594 = vmatprep.subr.mxu0 %v723_v0 }
  0x54   :  { %595 = vmatpush3.msra.mxu0 %v75_v45 }
  0x55   :  { %596 = vmatprep.subr.mxu0 %v723_v0 }
  0x56   :  { %597 = vmatpush3.msra.mxu0 %v74_v46 }
  0x57   :  { %598 = vmatprep.subr.mxu0 %v723_v0 }
  0x58   :  { %599 = vmatpush3.msra.mxu0 %v73_v56 }
  0x59   :  { %600 = vmatprep.subr.mxu0 %v723_v0 }
  0x5a   :  { %601 = vmatpush3.msra.mxu0 %v72_v57 }
  0x5b   :  { %602 = vmatprep.subr.mxu0 %v723_v0 }
  0x5c   :  { %603 = vmatpush3.msra.mxu0 %v71_v58 }
  0xfc   :  { %v174_v52 = vpop.f32.mrf.mxu0 }
  0xfd   :  { %v175_v53 = vadd.f32 %v174_v52, %v107_v51 }
  0xfe   :  { %v536_v54 = vpop.f32.mrf.mxu0 }
  0xff   :  { %v178_v55 = vmax.f32 %v175_v53, 0.0 }
 0x101   :  { %570 = vmatmul.mubr.f32.vlgmr.msra.gmra.mxu1 %v178_v55 }
 0x102   :  { %639 = vmatprep.mubr.msk.f32.mxu1 %vm724_vm0, %v723_v0  ;;  %608 = vmatpush3.msra.mxu1 %v102_v59 }
 0x103   :  { %609 = vmatprep.subr.mxu1 %v723_v0 }
 0x104   :  { %610 = vmatpush3.msra.mxu1 %v101_v60 }
 0x105   :  { %611 = vmatprep.subr.mxu1 %v723_v0 }
 0x106   :  { %612 = vmatpush3.msra.mxu1 %v100_v61 }
 0x107   :  { %613 = vmatprep.subr.mxu1 %v723_v0 }
 0x108   :  { %614 = vmatpush3.msra.mxu1 %v99_v62 }
 0x109   :  { %615 = vmatprep.subr.mxu1 %v723_v0 }
 0x10a   :  { %616 = vmatpush3.msra.mxu1 %v98_v63 }
 0x10b   :  { %617 = vmatprep.subr.mxu1 %v723_v0 }
 0x10c   :  { %618 = vmatpush3.msra.mxu1 %v97_v1 }
 0x10d   :  { %619 = vmatprep.subr.mxu1 %v723_v0 }
 0x10e   :  { %620 = vmatpush3.msra.mxu1 %v96_v2 }
 0x10f   :  { %621 = vmatprep.subr.mxu1 %v723_v0 }
 0x110   :  { %622 = vmatpush3.msra.mxu1 %v95_v3 }
 0x111   :  { %623 = vmatprep.subr.mxu1 %v723_v0 }
 0x112   :  { %624 = vmatpush3.msra.mxu1 %v94_v4 }
 0x113   :  { %625 = vmatprep.subr.mxu1 %v723_v0 }
 0x114   :  { %626 = vmatpush3.msra.mxu1 %v93_v5 }
 0x115   :  { %627 = vmatprep.subr.mxu1 %v723_v0 }
 0x116   :  { %628 = vmatpush3.msra.mxu1 %v92_v6 }
 0x117   :  { %629 = vmatprep.subr.mxu1 %v723_v0 }
 0x118   :  { %630 = vmatpush3.msra.mxu1 %v91_v7 }
 0x119   :  { %631 = vmatprep.subr.mxu1 %v723_v0 }
 0x11a   :  { %632 = vmatpush3.msra.mxu1 %v90_v8 }
 0x11b   :  { %633 = vmatprep.subr.mxu1 %v723_v0 }
 0x11c   :  { %634 = vmatpush3.msra.mxu1 %v89_v15 }
 0x11d   :  { %635 = vmatprep.subr.mxu1 %v723_v0 }
 0x11e   :  { %636 = vmatpush3.msra.mxu1 %v88_v16 }
 0x11f   :  { %637 = vmatprep.subr.mxu1 %v723_v0 }
 0x120   :  { %638 = vmatpush3.msra.mxu1 %v87_v17 }
 0x1c1   :  { %v249_v11 = vpop.f32.mrf.mxu1 }
 0x1c2   :  { %v250_v12 = vadd.f32 %v249_v11, %v182_v10 }
 0x1c3   :  { %v571_v13 = vpop.f32.mrf.mxu1 }
 0x1c4   :  { %v253_v14 = vmax.f32 %v250_v12, 0.0 }
 0x1c6   :  { %605 = vmatmul.mubr.f32.vlgmr.msra.gmra.mxu0 %v253_v14 }
 0x286   :  { %v324_v20 = vpop.f32.mrf.mxu0 }
 0x287   :  { %v325_v21 = vadd.f32 %v324_v20, %v257_v19 }
 0x288   :  { %v606_v22 = vpop.f32.mrf.mxu0 }
 0x289   :  { %v328_v23 = vmax.f32 %v325_v21, 0.0 }
 0x28b   :  { %640 = vmatmul.mubr.f32.vlgmr.msra.gmra.mxu1 %v328_v23 }
 0x34b   :  { %v399_v27 = vpop.f32.mrf.mxu1 }
 0x34c   :  { %v400_v28 = vadd.f32 %v399_v27, %v332_v25 }
 0x34d   :  { %v641_v0 = vpop.f32.mrf.mxu1 }
 0x34e   :  { %v403_v29 = vmax.f32 %v400_v28, 0.0 }
 0x350   :  { %v407_v30 = vsel %vm406_vm1, %v403_v29, -inf }
 0x351   :  { %408 = vmax.xlane.f32.xlu0 %v407_v30 }
 0x3da   :  { %v409_v31 = vpop.xlane.xlu0 %408 }
 0x3db   :  { %v410_v32 = vsub.f32 %v407_v30, %v409_v31 }
 0x3dd   :  { %v411_v33 = vmul.f32 1.442695, %v410_v32 }
 0x3df   :  { %649 = vpow2.f32 %v411_v33 }
 0x3ec   :  { %v650_v34 = vpop.eup %649 }
 0x3ed   :  { %413 = vadd.xlane.f32.xlu0 %v650_v34 }
 0x476   :  { %v414_v35 = vpop.xlane.xlu0 %413 }
 0x477   :  { %651 = vrcp.f32 %v414_v35 }
 0x484   :  { %v652_v36 = vpop.eup %651 }
 0x485   :  { %v416_v37 = vmul.f32 %v652_v36, %v650_v34 }
 0x487   :  { %417 = vst [vmem:[#allocation7] sm:$0xff] %v416_v37 }
 0x488   :  { %704 = shalt.err (!%p701_p0)
}
 0x489   :  { %427 = dma.vmem_to_hbm [thread:$0]  %s425_s1, 128, %s838_s2, [#allocation4]  }
 0x48a   :  { %717 = dma.done.wait [#allocation4], 128  }
 0x48b   :  { %718 = vsyncadd [#allocation4], 4294967168 }
 0x48c   :  { %431 = vsyncpa [#allocation3], 1 }
 0x48d   :  { %432 = vsyncpa [#allocation6], 1 }
 0x48e   :  { %433 = vsyncpa [#allocation4], 1 }

</bundles_post_ra>
